<compile_context>
chip_gen: v5e
topology: v5e:2x2
jax: 0.10.0
libtpu: 0.0.40
codegen_flags: <defaults>
</compile_context>

<pallas_src>
import functools
import math

import numpy as np

import jax
import jax.numpy as jnp
from jax import lax
from jax.experimental import pallas as pl
from jax.experimental.pallas import tpu as pltpu

FS = 30
WIN_SEC = 1.6
L = int(math.ceil(WIN_SEC * FS))  # 48-frame sliding window


# ---------------------------------------------------------------------------
# Kernel 1: per-frame spatial mean   (T, H, W, 3) -> (T, 128)  [cols 0..2 = RGB]
# ---------------------------------------------------------------------------
def _pick_lane_tile(hw3, max_lane=4096):
    """Lane tile over the flattened H*W*3 axis.

    Must be a multiple of lcm(128, 3) = 384 (so the one-hot channel selector has
    a fixed phase across lane blocks) or the full width."""
    if hw3 <= max_lane:
        return hw3                       # single full-width block
    cand = (max_lane // 384) * 384
    while cand >= 384:
        if hw3 % cand == 0:
            return cand
        cand -= 384
    # TODO(synk): ragged lane tiling when hw3 has no multiple-of-384 divisor; the
    # full-width fallback is correct but can use a lot of VMEM for huge frames.
    return hw3


def _pick_time_tile(t, wt, max_block_bytes=4 << 20):
    """Time tile; budgeted against the f32-expanded in-kernel working set."""
    cands = (512, 256, 128, 64, 32, 16, 8)
    for tb in cands:                     # exact divisors first (no edge block)
        if t % tb == 0 and tb * wt * 4 <= max_block_bytes:
            return tb
    for tb in cands:                     # partial last block (time rows are independent)
        if tb <= max(8, t) and tb * wt * 4 <= max_block_bytes:
            return tb
    return 8


def _spatial_mean_kernel(x_ref, sel_ref, o_ref, *, inv_hw, split):
    k = pl.program_id(1)

    @pl.when(k == 0)
    def _():
        o_ref[...] = jnp.zeros_like(o_ref)

    xb = x_ref[...].astype(jnp.float32)              # dtype cast stays in-kernel
    hi = xb.astype(jnp.bfloat16)
    # One-hot selector matmul on the (otherwise idle) MXU: result column c < 3 is
    # the sum over lanes j of this block whose channel is c; cols 3..127 are 0.
    acc = jnp.dot(hi, sel_ref[...], preferred_element_type=jnp.float32)
    if split:
        # hi/lo bf16 split keeps float inputs ~f32-exact (selector is exact 0/1).
        lo = (xb - hi.astype(jnp.float32)).astype(jnp.bfloat16)
        acc = acc + jnp.dot(lo, sel_ref[...], preferred_element_type=jnp.float32)
    o_ref[...] += acc                                # lane-dense VMEM accumulator

    @pl.when(k == pl.num_programs(1) - 1)
    def _():
        o_ref[...] = o_ref[...] * inv_hw


def spatial_mean(frames):
    """frames: (T, H, W, 3), any real dtype.  -> (T, 128) f32, cols 0..2 = mean RGB."""
    t = frames.shape[0]
    c = frames.shape[-1]
    assert c == 3
    hw = int(np.prod(frames.shape[1:-1]))
    hw3 = hw * c
    x = frames.reshape(t, hw3)           # free reshape; channels stay fastest-varying
    wt = _pick_lane_tile(hw3)
    tb = _pick_time_tile(t, wt)
    grid = (pl.cdiv(t, tb), hw3 // wt)

    sel_np = np.zeros((wt, 128), np.float32)
    sel_np[np.arange(wt), np.arange(wt) % 3] = 1.0
    sel = jnp.asarray(sel_np, jnp.bfloat16)          # 0/1 is exact in bf16

    split = bool(np.issubdtype(np.dtype(frames.dtype), np.floating)
                 and np.dtype(frames.dtype).itemsize > 2)
    kernel = functools.partial(_spatial_mean_kernel, inv_hw=1.0 / hw, split=split)
    return pl.pallas_call(
        kernel,
        out_shape=jax.ShapeDtypeStruct((t, 128), jnp.float32),
        grid=grid,
        in_specs=[pl.BlockSpec((tb, wt), lambda i, k: (i, k)),
                  pl.BlockSpec((wt, 128), lambda i, k: (0, 0))],   # resident selector
        out_specs=pl.BlockSpec((tb, 128), lambda i, k: (i, 0)),
        compiler_params=pltpu.CompilerParams(
            dimension_semantics=("parallel", "arbitrary"),
            vmem_limit_bytes=32 * 1024 * 1024),
    )(x, sel)


# ---------------------------------------------------------------------------
# Kernel 2: POS sliding window + overlap-add, vectorized over windows
#           (3, Tpad) -> (1, Tpad)   [log-step shift-and-add doubling]
# ---------------------------------------------------------------------------
def _pos_kernel(r_ref, o_ref, xs_ref, ws_ref, *, t, nw):
    tpad = r_ref.shape[1]
    r = r_ref[...]                                       # (3, tpad); cols >= t are 0
    g = jnp.sum(r, axis=1, keepdims=True) * (1.0 / t)    # (3, 1) temporal means
    p = r - g                                            # centered (conditioning only)

    # 9 moment rows packed on sublanes:
    #   0..2: p0,p1,p2   3..5: p0p0,p1p0,p2p0   6..7: p1p1,p2p1   8: p2p2
    xs_ref[...] = jnp.zeros_like(xs_ref)
    xs_ref[0:3, :] = p
    xs_ref[3:6, :] = p * p[0:1, :]
    xs_ref[6:8, :] = p[1:3, :] * p[1:2, :]
    xs_ref[8:9, :] = p[2:3, :] * p[2:3, :]
    x9 = xs_ref[...]                                     # one aligned (16, tpad) read

    # Width-48 window sums via doubling (48 = 32 + 16):
    #   S[:, m] = sum_{j<48} x9[:, m+j]; valid for m <= tpad-48 >= nw-1.
    def shl(v, s):                                       # y[i] = v[(i + s) % tpad]
        return pltpu.roll(v, shift=(tpad - s) % tpad, axis=1)

    y2 = x9 + shl(x9, 1)
    y4 = y2 + shl(y2, 2)
    y8 = y4 + shl(y4, 4)
    y16 = y8 + shl(y8, 8)
    y32 = y16 + shl(y16, 16)
    S = y32 + shl(y16, 32)                               # (16, tpad)

    P0, P1, P2 = S[0:1, :], S[1:2, :], S[2:3, :]
    Q00, Q01, Q02 = S[3:4, :], S[4:5, :], S[5:6, :]
    Q11, Q12, Q22 = S[6:7, :], S[7:8, :], S[8:9, :]

    invL = 1.0 / float(L)
    g0, g1, g2 = g[0:1, 0:1], g[1:2, 0:1], g[2:3, 0:1]
    mu0 = g0 + P0 * invL                                 # per-window channel means
    mu1 = g1 + P1 * invL
    mu2 = g2 + P2 * invL
    C00 = Q00 - P0 * P0 * invL                           # centered covariance sums
    C01 = Q01 - P0 * P1 * invL
    C02 = Q02 - P0 * P2 * invL
    C11 = Q11 - P1 * P1 * invL
    C12 = Q12 - P1 * P2 * invL
    C22 = Q22 - P2 * P2 * invL
    i0 = pl.reciprocal(mu0, approx=True)                 # divides off the VALU slot
    i1 = pl.reciprocal(mu1, approx=True)
    i2 = pl.reciprocal(mu2, approx=True)
    # L*var(S0), L*var(S1); S0 = Cn1-Cn2, S1 = -2Cn0+Cn1+Cn2 (window means are 0)
    v0 = jnp.maximum(C11 * i1 * i1 - 2.0 * C12 * i1 * i2 + C22 * i2 * i2, 0.0)
    v1 = jnp.maximum(4.0 * C00 * i0 * i0 + C11 * i1 * i1 + C22 * i2 * i2
                     - 4.0 * C01 * i0 * i1 - 4.0 * C02 * i0 * i2
                     + 2.0 * C12 * i1 * i2, 0.0)
    alpha = jnp.sqrt(v0) * lax.rsqrt(v1 + 1e-24)         # std(S0)/std(S1), eps-guarded
    w0 = -2.0 * alpha * i0
    w1 = (1.0 + alpha) * i1
    w2 = (alpha - 1.0) * i2
    w3 = (w0 * P0 + w1 * P1 + w2 * P2) * invL            # per-window constant offset

    # Overlap-add  A_c[tau] = sum_{windows m covering tau} w_c(m): zero the
    # invalid tail (>= nw) so the roll wrap-around below only brings in zeros,
    # then run the same doubling in the other direction.
    valid = lax.broadcasted_iota(jnp.int32, (1, tpad), 1) < nw
    ws_ref[...] = jnp.zeros_like(ws_ref)
    ws_ref[0:1, :] = jnp.where(valid, w0, 0.0)
    ws_ref[1:2, :] = jnp.where(valid, w1, 0.0)
    ws_ref[2:3, :] = jnp.where(valid, w2, 0.0)
    ws_ref[3:4, :] = jnp.where(valid, w3, 0.0)
    W = ws_ref[...]                                      # (8, tpad)

    def shr(v, s):                                       # y[i] = v[(i - s) % tpad]
        return pltpu.roll(v, shift=s, axis=1)

    b2 = W + shr(W, 1)
    b4 = b2 + shr(b2, 2)
    b8 = b4 + shr(b4, 4)
    b16 = b8 + shr(b8, 8)
    b32 = b16 + shr(b16, 16)
    A = b32 + shr(b16, 32)                               # rows 0..3 = A0..A3

    o_ref[...] = (p[0:1, :] * A[0:1, :] + p[1:2, :] * A[1:2, :]
                  + p[2:3, :] * A[2:3, :] - A[3:4, :])


def pos_overlap_add(rgb_pad, t):
    """rgb_pad: (3, tpad) f32, zero past column t.  Returns (1, tpad) POS signal."""
    c, tpad = rgb_pad.shape
    assert c == 3 and t > L and tpad >= t
    # nw = t - L reproduces the reference loop exactly (last frame never enters a window).
    nw = t - L
    kernel = functools.partial(_pos_kernel, t=t, nw=nw)
    return pl.pallas_call(
        kernel,
        out_shape=jax.ShapeDtypeStruct((1, tpad), jnp.float32),
        scratch_shapes=[pltpu.VMEM((16, tpad), jnp.float32),
                        pltpu.VMEM((8, tpad), jnp.float32)],
    )(rgb_pad)


# ---------------------------------------------------------------------------
# Kernel 3: detrend apply   out(1,T) = sig(1,T) @ A(T,T)   (A symmetric), tiled
# ---------------------------------------------------------------------------
_DETREND_CACHE = {}


def _detrend_apad(t, lam, tile):
    """Cached, zero-padded f32 detrend matrix  A = I - inv(I + lam^2 D^T D)  on device."""
    key = (int(t), float(lam), int(tile))
    if key not in _DETREND_CACHE:
        eye = np.identity(t)
        d = np.zeros((t - 2, t))
        idx = np.arange(t - 2)
        d[idx, idx] = 1.0
        d[idx, idx + 1] = -2.0
        d[idx, idx + 2] = 1.0
        # TODO(synk): exploit the pentadiagonal structure instead of the dense
        # O(T^3) host inverse if T gets very large.
        a_mat = eye - np.linalg.inv(eye + (lam ** 2) * (d.T @ d))
        tp = ((t + tile - 1) // tile) * tile
        a_pad = np.zeros((tp, tp), np.float32)
        a_pad[:t, :t] = a_mat.astype(np.float32)
        # Note: streaming A in bf16 would halve kernel-3 HBM bytes (~2x) at ~1e-3
        # relative error; kept in f32 to preserve reference numerics.
        _DETREND_CACHE[key] = jnp.asarray(a_pad)
    return _DETREND_CACHE[key]


def _detrend_kernel(s_ref, a_ref, o_ref, *, tile):
    k = pl.program_id(1)

    @pl.when(k == 0)
    def _():
        o_ref[...] = jnp.zeros_like(o_ref)

    kk = pl.multiple_of(k * tile, 128)
    sb = s_ref[:, pl.ds(kk, tile)]        # slice the resident signal by reduction step
    o_ref[...] += jnp.dot(sb, a_ref[...], preferred_element_type=jnp.float32)


def detrend_apply(sig_t, lam=100.0):
    """A @ sig computed as sig @ A (A is symmetric).  sig_t: (T,) f32 -> (T,) f32."""
    t = sig_t.shape[0]
    tile = 512 if t >= 512 else ((t + 127) // 128) * 128
    a_pad = _detrend_apad(t, lam, tile)
    tp = a_pad.shape[0]
    # 8 signal rows (row 0 real, rest zero) keep the MXU / output tiles standard.
    sig_pad = jnp.zeros((8, tp), jnp.float32).at[0, :t].set(sig_t)

    out = pl.pallas_call(
        functools.partial(_detrend_kernel, tile=tile),
        out_shape=jax.ShapeDtypeStruct((8, tp), jnp.float32),
        grid=(tp // tile, tp // tile),
        in_specs=[pl.BlockSpec((8, tp), lambda j, k: (0, 0)),        # resident signal
                  pl.BlockSpec((tile, tile), lambda j, k: (k, j))],  # stream A
        out_specs=pl.BlockSpec((8, tile), lambda j, k: (0, j)),      # resident over k
        compiler_params=pltpu.CompilerParams(
            dimension_semantics=("parallel", "arbitrary"),
            vmem_limit_bytes=32 * 1024 * 1024),
    )(sig_pad, a_pad)
    return out[0, :t]


# ---------------------------------------------------------------------------
# Host glue: Butterworth design + filtfilt (exact scipy semantics)
# ---------------------------------------------------------------------------
def _butter_bandpass_order1(low, high):
    # scipy.signal.butter(1, [low, high], 'bandpass'): 1/(s+1) -> lp2bp -> bilinear(fs=2)
    wl = 4.0 * math.tan(math.pi * low / 2.0)
    wh = 4.0 * math.tan(math.pi * high / 2.0)
    bw = wh - wl
    wo2 = wl * wh
    d0 = 16.0 + 4.0 * bw + wo2
    b = np.array([4.0 * bw, 0.0, -4.0 * bw]) / d0
    a = np.array([d0, 2.0 * wo2 - 32.0, 16.0 - 4.0 * bw + wo2]) / d0
    return b, a


def _lfilter_zi(b, a):
    i_minus_a = np.array([[1.0 + a[1], -1.0],
                          [a[2], 1.0]])
    rhs = np.array([b[1] - a[1] * b[0], b[2] - a[2] * b[0]])
    return np.linalg.solve(i_minus_a, rhs)


def _lfilter(b, a, x, zi):
    y = np.empty_like(x)
    z0, z1 = float(zi[0]), float(zi[1])
    for i in range(x.shape[0]):
        xi = x[i]
        yi = b[0] * xi + z0
        z0 = b[1] * xi + z1 - a[1] * yi
        z1 = b[2] * xi - a[2] * yi
        y[i] = yi
    return y


def _filtfilt(b, a, x):
    # TODO(synk): filtfilt is an inherently sequential IIR pass; kept on host.
    try:
        from scipy import signal as _sps
    except ImportError:
        _sps = None
    if _sps is not None:
        return _sps.filtfilt(np.asarray(b), np.asarray(a), x)
    padlen = 3 * max(len(a), len(b))
    assert x.shape[0] > padlen
    left = 2.0 * x[0] - x[padlen:0:-1]
    right = 2.0 * x[-1] - x[-2:-(padlen + 2):-1]
    ext = np.concatenate([left, x, right])
    zi = _lfilter_zi(b, a)
    y = _lfilter(b, a, ext, zi * ext[0])
    y = _lfilter(b, a, y[::-1], zi * y[-1])
    y = y[::-1]
    return y[padlen:-padlen]


# ---------------------------------------------------------------------------
# Full forward pass
# ---------------------------------------------------------------------------
def pos_wang_forward(frames):
    """frames: (T, H, W, 3), channels-last.  Returns BVP of shape (T,)."""
    t = frames.shape[0]
    assert frames.shape[-1] == 3
    assert t > L, "need more frames than the 48-frame POS window"

    # 1) per-frame spatial mean (Pallas; MXU one-hot selector, lane-dense output)
    rgb128 = spatial_mean(frames)                    # (T, 128) f32, cols 0..2 = RGB

    # 2) POS sliding-window overlap-add, vectorized via log-step doubling (Pallas)
    tpad = ((t + 127) // 128) * 128                  # lane-friendly length
    rgb_pad = jnp.zeros((3, tpad), jnp.float32).at[:, :t].set(
        jnp.transpose(rgb128[:, :3]))                # tiny (T,3)->(3,T) relayout
    pos_h = pos_overlap_add(rgb_pad, t)              # (1, tpad)

    # 3) detrend via cached (T,T) matrix applied by a tiled Pallas matmul
    bvp = detrend_apply(pos_h[0, :t], 100.0)         # (T,)

    # 4) band-pass filtfilt (host glue, exact scipy semantics)
    bvp_np = np.asarray(jax.block_until_ready(bvp), dtype=np.float64)
    b, a = _butter_bandpass_order1(0.75 / FS * 2.0, 3.0 / FS * 2.0)
    out = _filtfilt(b, a, bvp_np)
    return jnp.asarray(out, jnp.float32)


if __name__ == "__main__":
    key = jax.random.PRNGKey(0)
    T, H, W, C = 64, 8, 8, 3      # T must exceed the 48-frame POS window
    frames = jax.random.uniform(key, (T, H, W, C), dtype=jnp.float32,
                                minval=0.1, maxval=1.0)
    bvp = pos_wang_forward(frames)
    bvp = jax.block_until_ready(bvp)
    assert bvp.shape == (T,)
    assert bool(jnp.all(jnp.isfinite(bvp)))
    print("KERNEL_OK")
</pallas_src>

<mosaic_0001>
module attributes {stable_mosaic.version = 11 : i64} {
  func.func @_spatial_mean_kernel(%arg0: i32, %arg1: i32, %arg2: memref<64x192xf32, #tpu.memory_space<vmem>>, %arg3: memref<192x128xbf16, #tpu.memory_space<vmem>>, %arg4: memref<64x128xf32, #tpu.memory_space<vmem>>) attributes {dimension_semantics = [#tpu.dimension_semantics<parallel>, #tpu.dimension_semantics<arbitrary>], iteration_bounds = array<i64: 1, 1>, scalar_prefetch = 0 : i64, scratch_operands = 0 : i64, tpu.core_type = #tpu.core_type<tc>, window_params = [{transform_indices = @transform_0, window_bounds = array<i64: 64, 192>}, {pipeline_mode = #tpu.pipeline_mode<synchronous>, transform_indices = @transform_1, window_bounds = array<i64: 192, 128>}, {transform_indices = @transform_2, window_bounds = array<i64: 64, 128>}]} {
    %c0_i32 = arith.constant 0 : i32
    %0 = arith.cmpi eq, %arg1, %c0_i32 : i32
    %1 = arith.extui %0 : i1 to i32
    %c0_i32_0 = arith.constant 0 : i32
    %2 = arith.cmpi ne, %1, %c0_i32_0 : i32
    scf.if %2 {
      %cst_13 = arith.constant 0.000000e+00 : f32
      %19 = vector.broadcast %cst_13 : f32 to vector<64x128xf32>
      %c0_14 = arith.constant 0 : index
      %c0_15 = arith.constant 0 : index
      %20 = vector.load %arg4[%c0_14, %c0_15] : memref<64x128xf32, #tpu.memory_space<vmem>>, vector<64x128xf32>
      tpu.vector_store %arg4[%c0_14, %c0_15], %19 {strides = array<i32>} : memref<64x128xf32, #tpu.memory_space<vmem>>, vector<64x128xf32>,
    } else {
    }
    %c0 = arith.constant 0 : index
    %c0_1 = arith.constant 0 : index
    %3 = vector.load %arg2[%c0, %c0_1] : memref<64x192xf32, #tpu.memory_space<vmem>>, vector<64x192xf32>
    %4 = arith.truncf %3 : vector<64x192xf32> to vector<64x192xbf16>
    %c0_2 = arith.constant 0 : index
    %c0_3 = arith.constant 0 : index
    %5 = vector.load %arg3[%c0_2, %c0_3] : memref<192x128xbf16, #tpu.memory_space<vmem>>, vector<192x128xbf16>
    %cst = arith.constant dense<0.000000e+00> : vector<64x128xf32>
    %6 = tpu.matmul %4, %5, %cst {dimension_numbers = #tpu.dot_dimension_numbers<[1], [0], [0], [1], [0, 0, 1, 1], [], []>} : vector<64x192xbf16>, vector<192x128xbf16>, vector<64x128xf32> -> vector<64x128xf32>
    %7 = arith.extf %4 : vector<64x192xbf16> to vector<64x192xf32>
    %8 = arith.subf %3, %7 : vector<64x192xf32>
    %9 = arith.truncf %8 : vector<64x192xf32> to vector<64x192xbf16>
    %c0_4 = arith.constant 0 : index
    %c0_5 = arith.constant 0 : index
    %10 = vector.load %arg3[%c0_4, %c0_5] : memref<192x128xbf16, #tpu.memory_space<vmem>>, vector<192x128xbf16>
    %cst_6 = arith.constant dense<0.000000e+00> : vector<64x128xf32>
    %11 = tpu.matmul %9, %10, %cst_6 {dimension_numbers = #tpu.dot_dimension_numbers<[1], [0], [0], [1], [0, 0, 1, 1], [], []>} : vector<64x192xbf16>, vector<192x128xbf16>, vector<64x128xf32> -> vector<64x128xf32>
    %12 = arith.addf %6, %11 : vector<64x128xf32>
    %c0_7 = arith.constant 0 : index
    %c0_8 = arith.constant 0 : index
    %13 = vector.load %arg4[%c0_7, %c0_8] : memref<64x128xf32, #tpu.memory_space<vmem>>, vector<64x128xf32>
    %14 = arith.addf %13, %12 : vector<64x128xf32>
    %c0_9 = arith.constant 0 : index
    %c0_10 = arith.constant 0 : index
    %15 = vector.load %arg4[%c0_9, %c0_10] : memref<64x128xf32, #tpu.memory_space<vmem>>, vector<64x128xf32>
    tpu.vector_store %arg4[%c0_9, %c0_10], %14 {strides = array<i32>} : memref<64x128xf32, #tpu.memory_space<vmem>>, vector<64x128xf32>,
    %c0_i32_11 = arith.constant 0 : i32
    %16 = arith.cmpi eq, %arg1, %c0_i32_11 : i32
    %17 = arith.extui %16 : i1 to i32
    %c0_i32_12 = arith.constant 0 : i32
    %18 = arith.cmpi ne, %17, %c0_i32_12 : i32
    scf.if %18 {
      %c0_13 = arith.constant 0 : index
      %c0_14 = arith.constant 0 : index
      %19 = vector.load %arg4[%c0_13, %c0_14] : memref<64x128xf32, #tpu.memory_space<vmem>>, vector<64x128xf32>
      %cst_15 = arith.constant 1.562500e-02 : f32
      %20 = vector.broadcast %cst_15 : f32 to vector<64x128xf32>
      %21 = arith.mulf %19, %20 : vector<64x128xf32>
      %c0_16 = arith.constant 0 : index
      %c0_17 = arith.constant 0 : index
      %22 = vector.load %arg4[%c0_16, %c0_17] : memref<64x128xf32, #tpu.memory_space<vmem>>, vector<64x128xf32>
      tpu.vector_store %arg4[%c0_16, %c0_17], %21 {strides = array<i32>} : memref<64x128xf32, #tpu.memory_space<vmem>>, vector<64x128xf32>,
    } else {
    }
    return
  }
  func.func @transform_0(%arg0: i32, %arg1: i32) -> (i32, i32) {
    %c0_i32 = arith.constant 0 : i32
    return %arg0, %arg1 : i32, i32
  }
  func.func @transform_1(%arg0: i32, %arg1: i32) -> (i32, i32) {
    %c0_i32 = arith.constant 0 : i32
    %c0_i32_0 = arith.constant 0 : i32
    %c0_i32_1 = arith.constant 0 : i32
    return %c0_i32, %c0_i32_0 : i32, i32
  }
  func.func @transform_2(%arg0: i32, %arg1: i32) -> (i32, i32) {
    %c0_i32 = arith.constant 0 : i32
    %c0_i32_0 = arith.constant 0 : i32
    return %arg0, %c0_i32 : i32, i32
  }
}

</mosaic_0001>

<bundles_post_ra>
// kernel: tpu_custom_call.1
= control target key start
LH: loop header
LB: loop body
LE: loop exit
PB: predicated region body
PF: predicated region fallthrough
CT: control target
= control target key end

     0   :  { %7 = vsyncpa [#allocation3], 0  ;;  %s662_s0 = inlined_call_operand.hbm [shape: f32[64,192], index: 0, kind: input, shape index: {}]   ;;  %s663_s1 = inlined_call_operand.hbm [shape: bf16[192,128], index: 1, kind: input, shape index: {}]   ;;  %s664_s2 = inlined_call_operand.hbm [shape: f32[64,128], index: 2, kind: output, shape index: {}]  }
   0x1   :  { %8 = vsyncpa [#allocation6], 0 }
   0x2   :  { %9 = vsyncpa [#allocation4], 0  ;;  %s14_s11 = sshll.u32 %s662_s0, 4  ;;  %s621_s12 = smov [#allocation2]   ;;  %s15_s11 = int_to_ptr.hbm [resolvable:$true] %s14_s11 }
   0x3   :  { %s16_s13 = sshll.u32 %s621_s12, 4  ;;  %s27_s16 = sshll.u32 %s663_s1, 4  ;;  %s17_s13 = int_to_ptr.vmem [resolvable:$true] %s16_s13  ;;  %s28_s16 = int_to_ptr.hbm [resolvable:$true] %s27_s16 }
   0x4   :  { %s622_s17 = smov 256   ;;  %s623_s18 = smov 16  }
   0x5   :  { %22 = dma.hbm_to_vmem [thread:$0]  %s15_s11, 2048, %s17_s13, [#allocation3], %s622_s17, %s622_s17, %s623_s18  }
   0x6   :  { %s624_s19 = smov [#allocation5]   ;;  %s625_s21 = smov 64  }
   0x7   :  { %s29_s20 = sshll.u32 %s624_s19, 4  ;;  %s626_s22 = smov 4   ;;  %s30_s20 = int_to_ptr.vmem [resolvable:$true] %s29_s20 }
   0x8   :  { %35 = dma.hbm_to_vmem [thread:$0]  %s28_s16, 1536, %s30_s20, [#allocation6], %s625_s21, %s625_s21, %s626_s22  }
   0x9   :  { %615 = dma.done.wait [#allocation3], 2048  }
   0xa   :  { %616 = vsyncadd [#allocation3], 4294965248 }
   0xb   :  { %617 = dma.done.wait [#allocation6], 1536  }
   0xc   :  { %618 = vsyncadd [#allocation6], 4294965760  ;;  %v528_v0 = vld [vmem:[#allocation5 + $0x38] sm:$0xff]  ;;  %v527_v2 = vld [vmem:[#allocation5 + $0x30] sm:$0xff]  ;;  %vm217_vm0 = vcmask 523264   ;;  %s627_s0 = smov [#allocation7]  }
   0xd   :  { %v532_v1 = vld [vmem:[#allocation5 + $0x58] sm:$0xff]  ;;  %230 = vmatpush.bf16.msra.mxu0 %v528_v0  ;;  %336 = vmatpush.bf16.msra.mxu2 %v528_v0  ;;  %v531_v3 = vld [vmem:[#allocation5 + $0x50] sm:$0xff]  ;;  %v57_v4 = vld [vmem:[#allocation2] sm:$0xff]  ;;  %s449_s1 = sshll.u32 %s627_s0, 4  ;;  %s451_s25 = sshll.u32 %s664_s2, 4  ;;  %s450_s1 = int_to_ptr.vmem [resolvable:$true] %s449_s1  ;;  %s452_s25 = int_to_ptr.hbm [resolvable:$true] %s451_s25 }
   0xe   :  { %369 = vmatpush.bf16.msra.mxu3 %v532_v1  ;;  %263 = vmatpush.bf16.msra.mxu1 %v532_v1  ;;  %v58_v5 = vld [vmem:[#allocation2 + $0x8] sm:$0xff]  ;;  %v59_v6 = vld [vmem:[#allocation2 + $0x10] sm:$0xff]  ;;  %v60_v7 = vld [vmem:[#allocation2 + $0x18] sm:$0xff]  ;;  %s628_s26 = smov 128   ;;  %s629_s27 = smov 8  }
   0xf   :  { %v73_v8 = vpack.c.bf16 %v58_v5, %v57_v4  ;;  %v74_v9 = vpack.c.bf16 %v60_v7, %v59_v6  ;;  %v526_v10 = vld [vmem:[#allocation5 + $0x28] sm:$0xff]  ;;  %v525_v14 = vld [vmem:[#allocation5 + $0x20] sm:$0xff]  ;;  %v524_v20 = vld [vmem:[#allocation5 + $0x18] sm:$0xff] }
  0x10   :  { %v530_v11 = vld [vmem:[#allocation5 + $0x48] sm:$0xff]  ;;  %v529_v15 = vld [vmem:[#allocation5 + $0x40] sm:$0xff]  ;;  %v63_v25 = vld [vmem:[#allocation2 + $0x30] sm:$0xff] }
  0x11   :  { %231 = vmatpush.bf16.msra.mxu0 %v527_v2  ;;  %337 = vmatpush.bf16.msra.mxu2 %v527_v2  ;;  %v106_v12 = vunpack.c.h.bf16 %v73_v8  ;;  %v108_v13 = vunpack.c.h.bf16 %v74_v9  ;;  %v297_v16 = vunpack.c.h.b16 %v73_v8  ;;  %v299_v17 = vunpack.c.h.b16 %v74_v9  ;;  %v61_v23 = vld [vmem:[#allocation2 + $0x20] sm:$0xff]  ;;  %v62_v24 = vld [vmem:[#allocation2 + $0x28] sm:$0xff]  ;;  %v64_v26 = vld [vmem:[#allocation2 + $0x38] sm:$0xff] }
  0x12   :  { %370 = vmatpush.bf16.msra.mxu3 %v531_v3  ;;  %264 = vmatpush.bf16.msra.mxu1 %v531_v3  ;;  %v523_v27 = vld [vmem:[#allocation5 + $0x10] sm:$0xff]  ;;  %v75_v28 = vpack.c.bf16 %v62_v24, %v61_v23  ;;  %v76_v29 = vpack.c.bf16 %v64_v26, %v63_v25  ;;  %v105_v30 = vunpack.c.l.bf16 %v73_v8  ;;  %v107_v31 = vunpack.c.l.bf16 %v74_v9  ;;  %v522_v32 = vld [vmem:[#allocation5 + $0x8] sm:$0xff]  ;;  %v521_v39 = vld [vmem:[#allocation5] sm:$0xff] }
  0x13   :  { %v122_v18 = vsub.f32 %v58_v5, %v106_v12  ;;  %v124_v19 = vsub.f32 %v60_v7, %v108_v13  ;;  %v313_v21 = vpack.c.b16 %v299_v17, %v297_v16  ;;  %v296_v37 = vunpack.c.l.b16 %v73_v8  ;;  %v65_v48 = vld [vmem:[#allocation2 + $0x40] sm:$0xff]  ;;  %v66_v49 = vld [vmem:[#allocation2 + $0x48] sm:$0xff]  ;;  %v67_v50 = vld [vmem:[#allocation2 + $0x50] sm:$0xff] }
  0x14   :  { %v110_v33 = vunpack.c.h.bf16 %v75_v28  ;;  %v112_v34 = vunpack.c.h.bf16 %v76_v29  ;;  %v121_v35 = vsub.f32 %v57_v4, %v105_v30  ;;  %v123_v36 = vsub.f32 %v59_v6, %v107_v31  ;;  %v68_v51 = vld [vmem:[#allocation2 + $0x58] sm:$0xff]  ;;  %v69_v6 = vld [vmem:[#allocation2 + $0x60] sm:$0xff]  ;;  %v70_v7 = vld [vmem:[#allocation2 + $0x68] sm:$0xff] }
  0x15   :  { %232 = vmatpush.bf16.msra.mxu0 %v526_v10  ;;  %338 = vmatpush.bf16.msra.mxu2 %v526_v10  ;;  %v138_v22 = vpack.c.bf16 %v124_v19, %v122_v18  ;;  %v298_v38 = vunpack.c.l.b16 %v74_v9  ;;  %v301_v40 = vunpack.c.h.b16 %v75_v28  ;;  %v303_v41 = vunpack.c.h.b16 %v76_v29  ;;  %v71_v8 = vld [vmem:[#allocation2 + $0x70] sm:$0xff]  ;;  %v72_v9 = vld [vmem:[#allocation2 + $0x78] sm:$0xff] }
  0x16   :  { %371 = vmatpush.bf16.msra.mxu3 %v530_v11  ;;  %265 = vmatpush.bf16.msra.mxu1 %v530_v11  ;;  %v126_v42 = vsub.f32 %v62_v24, %v110_v33  ;;  %v128_v43 = vsub.f32 %v64_v26, %v112_v34  ;;  %v137_v44 = vpack.c.bf16 %v123_v36, %v121_v35  ;;  %v109_v54 = vunpack.c.l.bf16 %v75_v28 }
  0x17   :  { %v312_v45 = vpack.c.b16 %v298_v38, %v296_v37  ;;  %v315_v46 = vpack.c.b16 %v303_v41, %v301_v40  ;;  %v77_v52 = vpack.c.bf16 %v66_v49, %v65_v48  ;;  %v78_v53 = vpack.c.bf16 %v68_v51, %v67_v50 }
  0x18   :  { %v140_v47 = vpack.c.bf16 %v128_v43, %v126_v42  ;;  %v111_v55 = vunpack.c.l.bf16 %v76_v29  ;;  %v125_v58 = vsub.f32 %v61_v23, %v109_v54  ;;  %v300_v60 = vunpack.c.l.b16 %v75_v28 }
  0x19   :  { %233 = vmatpush.bf16.msra.mxu0 %v525_v14  ;;  %339 = vmatpush.bf16.msra.mxu2 %v525_v14  ;;  %v114_v56 = vunpack.c.h.bf16 %v77_v52  ;;  %v116_v57 = vunpack.c.h.bf16 %v78_v53  ;;  %v302_v61 = vunpack.c.l.b16 %v76_v29  ;;  %v305_v62 = vunpack.c.h.b16 %v77_v52 }
  0x1a   :  { %372 = vmatpush.bf16.msra.mxu3 %v529_v15  ;;  %266 = vmatpush.bf16.msra.mxu1 %v529_v15  ;;  %v127_v59 = vsub.f32 %v63_v25, %v111_v55  ;;  %v307_v63 = vunpack.c.h.b16 %v78_v53  ;;  %v79_v10 = vpack.c.bf16 %v70_v7, %v69_v6  ;;  %v80_v11 = vpack.c.bf16 %v72_v9, %v71_v8 }
  0x1b   :  { %v130_v0 = vsub.f32 %v66_v49, %v114_v56  ;;  %v132_v1 = vsub.f32 %v68_v51, %v116_v57  ;;  %v314_v3 = vpack.c.b16 %v302_v61, %v300_v60  ;;  %v113_v12 = vunpack.c.l.bf16 %v77_v52 }
  0x1c   :  { %v139_v2 = vpack.c.bf16 %v127_v59, %v125_v58  ;;  %v317_v4 = vpack.c.b16 %v307_v63, %v305_v62  ;;  %v115_v13 = vunpack.c.l.bf16 %v78_v53  ;;  %v118_v14 = vunpack.c.h.bf16 %v79_v10 }
  0x1d   :  { %234 = vmatpush.bf16.msra.mxu0 %v524_v20  ;;  %340 = vmatpush.bf16.msra.mxu2 %v524_v20  ;;  %v142_v5 = vpack.c.bf16 %v132_v1, %v130_v0  ;;  %v120_v15 = vunpack.c.h.bf16 %v80_v11  ;;  %v129_v16 = vsub.f32 %v65_v48, %v113_v12  ;;  %v304_v18 = vunpack.c.l.b16 %v77_v52 }
  0x1e   :  { %517 = vmatmul.msk.bf16.vlgmr.msra.gmra.mxu3 %vm217_vm0, %v313_v21  ;;  %513 = vmatmul.msk.bf16.vlgmr.msra.gmra.mxu1 %vm217_vm0, %v138_v22  ;;  %v131_v17 = vsub.f32 %v67_v50, %v115_v13  ;;  %v306_v19 = vunpack.c.l.b16 %v78_v53  ;;  %v309_v20 = vunpack.c.h.b16 %v79_v10  ;;  %v311_v21 = vunpack.c.h.b16 %v80_v11 }
  0x1f   :  { %v134_v22 = vsub.f32 %v70_v7, %v118_v14  ;;  %v136_v23 = vsub.f32 %v72_v9, %v120_v15  ;;  %v117_v28 = vunpack.c.l.bf16 %v79_v10  ;;  %v119_v29 = vunpack.c.l.bf16 %v80_v11 }
  0x20   :  { %v141_v24 = vpack.c.bf16 %v131_v17, %v129_v16  ;;  %v316_v25 = vpack.c.b16 %v306_v19, %v304_v18  ;;  %v319_v26 = vpack.c.b16 %v311_v21, %v309_v20  ;;  %v310_v33 = vunpack.c.l.b16 %v80_v11 }
  0x21   :  { %235 = vmatpush.bf16.msra.mxu0 %v523_v27  ;;  %341 = vmatpush.bf16.msra.mxu2 %v523_v27  ;;  %v144_v27 = vpack.c.bf16 %v136_v23, %v134_v22  ;;  %v133_v30 = vsub.f32 %v69_v6, %v117_v28  ;;  %v135_v31 = vsub.f32 %v71_v8, %v119_v29 }
  0x23   :  { %v143_v34 = vpack.c.bf16 %v135_v31, %v133_v30 }
  0x25   :  { %236 = vmatpush.bf16.msra.mxu0 %v522_v32  ;;  %342 = vmatpush.bf16.msra.mxu2 %v522_v32  ;;  %v308_v32 = vunpack.c.l.b16 %v79_v10 }
  0x27   :  { %v318_v35 = vpack.c.b16 %v310_v33, %v308_v32 }
  0x29   :  { %237 = vmatpush.bf16.msra.mxu0 %v521_v39  ;;  %343 = vmatpush.bf16.msra.mxu2 %v521_v39 }
  0x2c   :  { %238 = vmatmul.bf16.vlgmr.msra.gmra.mxu0 %v137_v44  ;;  %344 = vmatmul.bf16.vlgmr.msra.gmra.mxu2 %v312_v45 }
  0x2e   :  { %518 = vmatmul.msk.bf16.gmra.mxu3 %vm217_vm0, %v315_v46  ;;  %514 = vmatmul.msk.bf16.gmra.mxu1 %vm217_vm0, %v140_v47 }
  0x3c   :  { %243 = vmatmul.bf16.gmra.mxu0 %v139_v2  ;;  %349 = vmatmul.bf16.gmra.mxu2 %v314_v3 }
  0x3e   :  { %519 = vmatmul.msk.bf16.gmra.mxu3 %vm217_vm0, %v317_v4  ;;  %515 = vmatmul.msk.bf16.gmra.mxu1 %vm217_vm0, %v142_v5 }
  0x4c   :  { %248 = vmatmul.bf16.gmra.mxu0 %v141_v24  ;;  %354 = vmatmul.bf16.gmra.mxu2 %v316_v25 }
  0x4e   :  { %520 = vmatmul.msk.bf16.gmra.mxu3 %vm217_vm0, %v319_v26  ;;  %516 = vmatmul.msk.bf16.gmra.mxu1 %vm217_vm0, %v144_v27 }
  0x5c   :  { %253 = vmatmul.bf16.gmra.mxu0 %v143_v34  ;;  %359 = vmatmul.bf16.gmra.mxu2 %v318_v35 }
  0x9b   :  { %v268_v36 = vpop.f32.mrf.mxu1 }
  0xa1   :  { %v374_v37 = vpop.f32.mrf.mxu3 }
  0xa3   :  { %v270_v39 = vpop.f32.mrf.mxu1 }
  0xa9   :  { %v239_v38 = vpop.f32.mrf.mxu0  ;;  %v376_v41 = vpop.f32.mrf.mxu3 }
  0xaa   :  { %v269_v40 = vadd.f32 %v268_v36, %v239_v38 }
  0xab   :  { %v273_v46 = vpop.f32.mrf.mxu1 }
  0xaf   :  { %v345_v42 = vpop.f32.mrf.mxu2 }
  0xb0   :  { %v346_v43 = vadd.f32 %v345_v42, %v269_v40 }
  0xb1   :  { %v241_v44 = vpop.f32.mrf.mxu0  ;;  %v379_v50 = vpop.f32.mrf.mxu3 }
  0xb2   :  { %v375_v45 = vadd.f32 %v374_v37, %v346_v43  ;;  %v271_v48 = vadd.f32 %v270_v39, %v241_v44 }
  0xb3   :  { %v275_v55 = vpop.f32.mrf.mxu1 }
  0xb4   :  { %v429_v47 = vmul.f32 0.015625, %v375_v45 }
  0xb6   :  { %437 = vst [vmem:[#allocation7] sm:$0xff] %v429_v47 }
  0xb7   :  { %v347_v49 = vpop.f32.mrf.mxu2 }
  0xb8   :  { %v348_v51 = vadd.f32 %v347_v49, %v271_v48 }
  0xb9   :  { %v244_v52 = vpop.f32.mrf.mxu0  ;;  %v381_v60 = vpop.f32.mrf.mxu3 }
  0xba   :  { %v377_v53 = vadd.f32 %v376_v41, %v348_v51  ;;  %v274_v54 = vadd.f32 %v273_v46, %v244_v52 }
  0xbb   :  { %v278_v0 = vpop.f32.mrf.mxu1 }
  0xbc   :  { %v430_v56 = vmul.f32 0.015625, %v377_v53 }
  0xbe   :  { %438 = vst [vmem:[#allocation7 + $0x8] sm:$0xff] %v430_v56 }
  0xbf   :  { %v350_v57 = vpop.f32.mrf.mxu2 }
  0xc0   :  { %v351_v58 = vadd.f32 %v350_v57, %v274_v54 }
  0xc1   :  { %v246_v59 = vpop.f32.mrf.mxu0  ;;  %v384_v5 = vpop.f32.mrf.mxu3 }
  0xc2   :  { %v380_v61 = vadd.f32 %v379_v50, %v351_v58  ;;  %v276_v63 = vadd.f32 %v275_v55, %v246_v59 }
  0xc3   :  { %v280_v10 = vpop.f32.mrf.mxu1 }
  0xc4   :  { %v431_v62 = vmul.f32 0.015625, %v380_v61 }
  0xc6   :  { %439 = vst [vmem:[#allocation7 + $0x10] sm:$0xff] %v431_v62 }
  0xc7   :  { %v352_v1 = vpop.f32.mrf.mxu2 }
  0xc8   :  { %v353_v2 = vadd.f32 %v352_v1, %v276_v63 }
  0xc9   :  { %v249_v3 = vpop.f32.mrf.mxu0  ;;  %v386_v13 = vpop.f32.mrf.mxu3 }
  0xca   :  { %v382_v4 = vadd.f32 %v381_v60, %v353_v2  ;;  %v279_v6 = vadd.f32 %v278_v0, %v249_v3 }
  0xcb   :  { %v283_v20 = vpop.f32.mrf.mxu1 }
  0xcc   :  { %v432_v7 = vmul.f32 0.015625, %v382_v4 }
  0xce   :  { %440 = vst [vmem:[#allocation7 + $0x18] sm:$0xff] %v432_v7 }
  0xcf   :  { %v355_v8 = vpop.f32.mrf.mxu2 }
  0xd0   :  { %v356_v9 = vadd.f32 %v355_v8, %v279_v6 }
  0xd1   :  { %v251_v11 = vpop.f32.mrf.mxu0  ;;  %v389_v23 = vpop.f32.mrf.mxu3 }
  0xd2   :  { %v385_v12 = vadd.f32 %v384_v5, %v356_v9  ;;  %v281_v15 = vadd.f32 %v280_v10, %v251_v11 }
  0xd3   :  { %v285_v28 = vpop.f32.mrf.mxu1 }
  0xd4   :  { %v433_v14 = vmul.f32 0.015625, %v385_v12 }
  0xd6   :  { %441 = vst [vmem:[#allocation7 + $0x20] sm:$0xff] %v433_v14 }
  0xd7   :  { %v357_v16 = vpop.f32.mrf.mxu2 }
  0xd8   :  { %v358_v17 = vadd.f32 %v357_v16, %v281_v15 }
  0xd9   :  { %v254_v18 = vpop.f32.mrf.mxu0  ;;  %v391_v33 = vpop.f32.mrf.mxu3 }
  0xda   :  { %v387_v19 = vadd.f32 %v386_v13, %v358_v17  ;;  %v284_v21 = vadd.f32 %v283_v20, %v254_v18 }
  0xdc   :  { %v434_v22 = vmul.f32 0.015625, %v387_v19 }
  0xde   :  { %442 = vst [vmem:[#allocation7 + $0x28] sm:$0xff] %v434_v22 }
  0xdf   :  { %v360_v24 = vpop.f32.mrf.mxu2 }
  0xe0   :  { %v361_v25 = vadd.f32 %v360_v24, %v284_v21 }
  0xe1   :  { %v256_v27 = vpop.f32.mrf.mxu0 }
  0xe2   :  { %v390_v26 = vadd.f32 %v389_v23, %v361_v25  ;;  %v286_v30 = vadd.f32 %v285_v28, %v256_v27 }
  0xe4   :  { %v435_v29 = vmul.f32 0.015625, %v390_v26 }
  0xe6   :  { %443 = vst [vmem:[#allocation7 + $0x30] sm:$0xff] %v435_v29 }
  0xe7   :  { %v362_v31 = vpop.f32.mrf.mxu2 }
  0xe8   :  { %v363_v32 = vadd.f32 %v362_v31, %v286_v30 }
  0xea   :  { %v392_v34 = vadd.f32 %v391_v33, %v363_v32 }
  0xec   :  { %v436_v35 = vmul.f32 0.015625, %v392_v34 }
  0xee   :  { %444 = vst [vmem:[#allocation7 + $0x38] sm:$0xff] %v436_v35 }
  0xef   :  { %457 = dma.vmem_to_hbm [thread:$0]  %s450_s1, 1024, %s452_s25, [#allocation4], %s628_s26, %s628_s26, %s629_s27  }
  0xf0   :  { %619 = dma.done.wait [#allocation4], 1024  }
  0xf1   :  { %620 = vsyncadd [#allocation4], 4294966272 }
  0xf2   :  { %462 = vsyncpa [#allocation3], 1 }
  0xf3   :  { %463 = vsyncpa [#allocation6], 1 }
  0xf4   :  { %464 = vsyncpa [#allocation4], 1 }

</bundles_post_ra>
